<compile_context>
chip_gen: v7x
topology: tpu7x:2x2x1
jax: 0.10.0
libtpu: 0.0.40
codegen_flags: <defaults>
</compile_context>

<pallas_src>
import jax
import jax.numpy as jnp
from jax.experimental import pallas as pl
from jax.experimental.pallas import tpu as pltpu


def _ensemble_kernel(w_ref, x_ref, o_ref):
    """One batch tile of the ensemble forward.

    w_ref: (1, D)  softmax-normalized weights, f32, block pinned to (0, 0) so it
                   stays resident across grid steps (no re-DMA).
    x_ref: (TB, D) batch tile of inputs.
    o_ref: (1, TB) lane-dense weighted sums (one value per batch row).
    """
    w = w_ref[...]                                   # (1, D)  f32
    x = x_ref[...].astype(jnp.float32)               # (TB, D) f32 accumulation
    s = jnp.sum(w * x, axis=1)                       # (TB,)   VPU mul + XLU lane reduce
    # Relayout the sublane-oriented reduction to a lane-dense row for an
    # unmasked, dense HBM writeback.
    o_ref[...] = s.reshape(1, -1).astype(o_ref.dtype)


def _round_up(x, m):
    return ((x + m - 1) // m) * m


def _vmem_capacity_bytes(default=64 * 1024 * 1024):
    """Physical VMEM of the local TPU; conservative 64 MiB (v7x) fallback."""
    try:
        cap = getattr(pltpu.get_tpu_info(), "vmem_capacity_bytes", None)
        if cap:
            return int(cap)
    except Exception:
        pass
    return default


def _choose_batch_tile(B, D, itemsize, budget_bytes):
    """Pick a batch tile whose double-buffered x tile fits the VMEM budget.

    Byte-based cap: target ~8 MiB per x buffer (measured ~85%+ of HBM roofline),
    never more than budget/2 (two pipeline buffers).
    """
    sub = max(8, 32 // max(itemsize, 1))      # 8 f32, 16 bf16, 32 int8/fp8
    row_bytes = max(D * itemsize, 1)
    per_buf = min(8 * 1024 * 1024, budget_bytes // 2)
    tb = max(per_buf // row_bytes, sub)       # huge-D fallback handled by caller
    # Keep >= 2 grid steps when the batch allows it (v7x megacore: both TCs busy).
    if B > sub:
        tb = min(tb, _round_up(pl.cdiv(B, 2), sub))
    # Never bigger than the sublane-rounded batch.
    tb = min(tb, _round_up(B, sub))
    # Round to a clean multiple: 128 lanes once big enough (lane-dense output),
    # otherwise the dtype-native sublane multiple.
    unit = 128 if tb >= 128 else sub
    tb = max((tb // unit) * unit, sub)
    return tb


def simple_ensemble(x, weights):
    """x: (B, D), weights: (D,)  ->  (B, 1).  Pallas TPU implementation."""
    B, D = x.shape
    itemsize = jnp.dtype(x.dtype).itemsize

    # Generation-aware VMEM budget: 32 MiB limit / 24 MiB budget on v7x,
    # 64 MiB limit / 48 MiB budget on v5e/v6e.
    vmem_cap = _vmem_capacity_bytes()
    vmem_limit = min(vmem_cap // 2, 64 * 1024 * 1024)
    budget = (vmem_limit * 3) // 4

    tb = _choose_batch_tile(B, D, itemsize, budget)
    num_tiles = pl.cdiv(B, tb)

    # Huge-D guard: if even the minimal double-buffered tile exceeds the limit,
    # raise the limit up to physical capacity (fails loudly, never silently).
    # TODO(synk): for very large D add an "arbitrary" reduction grid axis over D
    # with an f32 VMEM accumulator instead of just raising the limit.
    needed = 2 * tb * D * itemsize + 2 * D * 4 + 2 * tb * itemsize + (1 << 20)
    if needed > vmem_limit:
        vmem_limit = min(needed, vmem_cap)

    # O(D) softmax once in the wrapper (not the O(B*D) pre-scale anti-pattern).
    w_norm = jax.nn.softmax(weights.astype(jnp.float32), axis=0).reshape(1, D)

    out = pl.pallas_call(
        _ensemble_kernel,
        out_shape=jax.ShapeDtypeStruct((num_tiles, tb), x.dtype),
        grid_spec=pltpu.PrefetchScalarGridSpec(
            num_scalar_prefetch=0,
            grid=(num_tiles,),
            in_specs=[
                pl.BlockSpec((1, D), lambda i: (0, 0)),    # weights: resident
                pl.BlockSpec((tb, D), lambda i: (i, 0)),   # x: tiled over batch (ragged tail OK)
            ],
            out_specs=pl.BlockSpec((1, tb), lambda i: (i, 0)),  # lane-dense rows
        ),
        compiler_params=pltpu.CompilerParams(
            dimension_semantics=("parallel",),             # megacore on v7x
            vmem_limit_bytes=int(vmem_limit),
        ),
    )(w_norm, x)

    # (num_tiles, tb) row-major -> flat batch order; drop the ragged tail.
    return out.reshape(-1)[:B].reshape(B, 1)


if __name__ == "__main__":
    key = jax.random.PRNGKey(0)
    B, D = 8, 32  # batch, input_dim

    # Deterministic init matching nn.Parameter(torch.ones(input_dim)/input_dim)
    weights = jnp.ones((D,), dtype=jnp.float32) / D
    x = jax.random.normal(key, (B, D), dtype=jnp.float32)

    out = simple_ensemble(x, weights)
    out = jax.block_until_ready(out)

    # Reference check in plain JAX.
    w_norm_ref = jax.nn.softmax(weights, axis=0)
    ref = jnp.sum(w_norm_ref * x, axis=1, keepdims=True)
    assert out.shape == (B, 1)
    assert jnp.allclose(out, ref, atol=1e-5, rtol=1e-5)

    print("KERNEL_OK")
</pallas_src>

<mosaic_0001>
module attributes {stable_mosaic.version = 11 : i64} {
  func.func @_ensemble_kernel(%arg0: i32, %arg1: memref<1x32xf32, #tpu.memory_space<vmem>>, %arg2: memref<8x32xf32, #tpu.memory_space<vmem>>, %arg3: memref<1x8xf32, #tpu.memory_space<vmem>>) attributes {dimension_semantics = [#tpu.dimension_semantics<parallel>], iteration_bounds = array<i64: 1>, scalar_prefetch = 0 : i64, scratch_operands = 0 : i64, tpu.core_type = #tpu.core_type<tc>, window_params = [{pipeline_mode = #tpu.pipeline_mode<synchronous>, transform_indices = @transform_0, window_bounds = array<i64: 1, 32>}, {transform_indices = @transform_1, window_bounds = array<i64: 8, 32>}, {transform_indices = @transform_2, window_bounds = array<i64: 1, 8>}]} {
    %c0 = arith.constant 0 : index
    %c0_0 = arith.constant 0 : index
    %0 = vector.load %arg1[%c0, %c0_0] : memref<1x32xf32, #tpu.memory_space<vmem>>, vector<1x32xf32>
    %c0_1 = arith.constant 0 : index
    %c0_2 = arith.constant 0 : index
    %1 = vector.load %arg2[%c0_1, %c0_2] : memref<8x32xf32, #tpu.memory_space<vmem>>, vector<8x32xf32>
    %2 = vector.broadcast %0 : vector<1x32xf32> to vector<8x32xf32>
    %3 = arith.mulf %2, %1 : vector<8x32xf32>
    %cst = arith.constant dense<0.000000e+00> : vector<8xf32>
    %4 = vector.multi_reduction <add>, %3, %cst [1] : vector<8x32xf32> to vector<8xf32>
    %5 = vector.shape_cast %4 : vector<8xf32> to vector<1x8xf32>
    %c0_3 = arith.constant 0 : index
    %c0_4 = arith.constant 0 : index
    %6 = vector.load %arg3[%c0_3, %c0_4] : memref<1x8xf32, #tpu.memory_space<vmem>>, vector<1x8xf32>
    tpu.vector_store %arg3[%c0_3, %c0_4], %5 {strides = array<i32>} : memref<1x8xf32, #tpu.memory_space<vmem>>, vector<1x8xf32>,
    return
  }
  func.func @transform_0(%arg0: i32) -> (i32, i32) {
    %c0_i32 = arith.constant 0 : i32
    %c0_i32_0 = arith.constant 0 : i32
    %c0_i32_1 = arith.constant 0 : i32
    return %c0_i32, %c0_i32_0 : i32, i32
  }
  func.func @transform_1(%arg0: i32) -> (i32, i32) {
    %c0_i32 = arith.constant 0 : i32
    %c0_i32_0 = arith.constant 0 : i32
    return %arg0, %c0_i32 : i32, i32
  }
  func.func @transform_2(%arg0: i32) -> (i32, i32) {
    %c0_i32 = arith.constant 0 : i32
    %c0_i32_0 = arith.constant 0 : i32
    return %arg0, %c0_i32 : i32, i32
  }
}

</mosaic_0001>

<bundles_post_ra>
// kernel: tpu_custom_call.1
= control target key start
LH: loop header
LB: loop body
LE: loop exit
PB: predicated region body
PF: predicated region fallthrough
CT: control target
= control target key end

     0   :  { %7 = vsyncpa [#allocation3], 0  ;;  %s205_s0 = inlined_call_operand.hbm [shape: f32[1,32], index: 0, kind: input, shape index: {}]   ;;  %s206_s1 = inlined_call_operand.hbm [shape: f32[8,32], index: 1, kind: input, shape index: {}]   ;;  %s207_s2 = inlined_call_operand.hbm [shape: f32[1,8], index: 2, kind: output, shape index: {}]  }
   0x1   :  { %8 = vsyncpa [#allocation6], 0 }
   0x2   :  { %9 = vsyncpa [#allocation4], 0  ;;  %s151_s9 = smov [#allocation2]   ;;  %s152_s11 = smov [#allocation5]  }
   0x3   :  { %s16_s10 = sshll.u32 %s151_s9, 4  ;;  %s26_s12 = sshll.u32 %s152_s11, 4  ;;  %s17_s10 = int_to_ptr.vmem [resolvable:$true] %s16_s10  ;;  %s27_s12 = int_to_ptr.vmem [resolvable:$true] %s26_s12 }
   0x4   :  { %s79_s15 = scalar_lea.hbm %s205_s0, 16 }
   0x5   :  { %p80_p0 = scmp.ne.s32.totalorder %s205_s0, %s79_s15  ;;  %p83_p1 = scmp.lt.u32.totalorder %s79_s15, %s205_s0 }
   0x7   :  { %p85_p2 = pnand %p83_p1, %p80_p0 }
   0x9   :  { %88 = shalt.err (!%p85_p2)
}
   0xa   :  { %s89_s20 = scalar_lea.vmem %s17_s10, 16  ;;  %s93_s21 = scalar_lea.vmem %s17_s10, 32 }
   0xb   :  { %p90_p3 = scmp.ne.s32.totalorder %s17_s10, %s89_s20  ;;  %p94_p4 = scmp.lt.s32.totalorder %s17_s10, %s17_s10 }
   0xc   :  { %p95_p5 = scmp.lt.s32.totalorder %s93_s21, %s89_s20 }
   0xe   :  { %p96_p6 = por %p95_p5, %p94_p4 }
  0x10   :  { %p97_p7 = pnand %p96_p6, %p90_p3 }
  0x12   :  { %100 = shalt.err (!%p97_p7)
}
  0x13   :  { %19 = dma.hbm_to_vmem [thread:$0]  %s205_s0, 16, %s17_s10, [#allocation3]  }
  0x14   :  { %s101_s26 = scalar_lea.hbm %s206_s1, 128 }
  0x15   :  { %p102_p8 = scmp.ne.s32.totalorder %s206_s1, %s101_s26  ;;  %p105_p9 = scmp.lt.u32.totalorder %s101_s26, %s206_s1 }
  0x17   :  { %p107_p10 = pnand %p105_p9, %p102_p8 }
  0x19   :  { %110 = shalt.err (!%p107_p10)
}
  0x1a   :  { %s111_s3 = scalar_lea.vmem %s27_s12, 128  ;;  %p116_p12 = scmp.lt.s32.totalorder %s27_s12, %s27_s12 }
  0x1b   :  { %p112_p11 = scmp.ne.s32.totalorder %s27_s12, %s111_s3  ;;  %p117_p13 = scmp.lt.s32.totalorder %s111_s3, %s111_s3 }
  0x1d   :  { %p118_p0 = por %p117_p13, %p116_p12 }
  0x1f   :  { %p119_p1 = pnand %p118_p0, %p112_p11 }
  0x21   :  { %122 = shalt.err (!%p119_p1)
}
  0x22   :  { %29 = dma.hbm_to_vmem [thread:$0]  %s206_s1, 128, %s27_s12, [#allocation6]  }
  0x23   :  { %145 = dma.done.wait [#allocation3], 16  }
  0x24   :  { %146 = vsyncadd [#allocation3], 4294967280 }
  0x25   :  { %147 = dma.done.wait [#allocation6], 128  }
  0x26   :  { %148 = vsyncadd [#allocation6], 4294967168  ;;  %v75_v0 = vld [vmem:[#allocation2] ss:$0 sm:$0xff]  ;;  %v37_v1 = vld [vmem:[#allocation5] sm:$0xff]  ;;  %vm45_vm0 = vcmask 261120   ;;  %v50_v4 = vlaneseq }
  0x27   :  { %v44_v2 = vmul.f32 %v75_v0, %v37_v1  ;;  %s153_s5 = smov [#allocation7]   ;;  %vm57_vm1 = vcmask 57344  }
  0x28   :  { %v51_v5 = vand.u32 127, %v50_v4  ;;  %v53_v6 = vshrl.u32 %v50_v4, 7  ;;  %s65_s6 = sshll.u32 %s153_s5, 4  ;;  %s66_s6 = int_to_ptr.vmem [resolvable:$true] %s65_s6 }
  0x29   :  { %v46_v3 = vsel %vm45_vm0, %v44_v2, 0.0  ;;  %s123_s1 = scalar_lea.vmem %s66_s6, 16  ;;  %s127_s7 = scalar_lea.vmem %s66_s6, 32 }
  0x2a   :  { %47 = vadd.xlane.f32.xlu0 %v46_v3  ;;  %v54_v7 = vsub.s32 %v51_v5, %v53_v6  ;;  %p124_p2 = scmp.ne.s32.totalorder %s66_s6, %s123_s1  ;;  %p128_p3 = scmp.lt.s32.totalorder %s66_s6, %s66_s6 }
  0x2b   :  { %p129_p4 = scmp.lt.s32.totalorder %s127_s7, %s123_s1 }
  0x2d   :  { %p130_p5 = por %p129_p4, %p128_p3 }
  0x2f   :  { %p131_p6 = pnand %p130_p5, %p124_p2 }
  0xb7   :  { %v48_v8 = vpop.xlane.xlu0 %47 }
  0xb8   :  { %v55_v9 = vrot.slane %v48_v8, %v54_v7 }
  0xba   :  { %58 = vst.msk [vmem:[#allocation7] sm:$0x1] %vm57_vm1, %v55_v9 }
  0xbb   :  { %134 = shalt.err (!%p131_p6)
}
  0xbc   :  { %s135_s10 = scalar_lea.hbm %s207_s2, 16 }
  0xbd   :  { %p136_p7 = scmp.ne.s32.totalorder %s207_s2, %s135_s10  ;;  %p139_p8 = scmp.lt.u32.totalorder %s135_s10, %s207_s2 }
  0xbf   :  { %p141_p9 = pnand %p139_p8, %p136_p7 }
  0xc1   :  { %144 = shalt.err (!%p141_p9)
}
  0xc2   :  { %68 = dma.vmem_to_hbm [thread:$0]  %s66_s6, 16, %s207_s2, [#allocation4]  }
  0xc3   :  { %149 = dma.done.wait [#allocation4], 16  }
  0xc4   :  { %150 = vsyncadd [#allocation4], 4294967280 }
  0xc5   :  { %72 = vsyncpa [#allocation3], 1 }
  0xc6   :  { %73 = vsyncpa [#allocation6], 1 }
  0xc7   :  { %74 = vsyncpa [#allocation4], 1 }

</bundles_post_ra>
